<compile_context>
chip_gen: v7x
topology: tpu7x:2x2x1
jax: 0.10.0
libtpu: 0.0.40
codegen_flags: <defaults>
</compile_context>

<pallas_src>
import jax
import jax.numpy as jnp
from jax.experimental import pallas as pl
from jax.experimental.pallas import tpu as pltpu


def _round_up(x, m):
    return ((x + m - 1) // m) * m


def _cdiv(a, b):
    return -(-a // b)


def _device_pack_cap():
    """v5 chips have a much weaker f32 MXU -> cap the pack^2 MAC inflation."""
    try:
        kind = jax.devices()[0].device_kind.lower()
    except Exception:
        kind = ""
    return 4 if "v5" in kind else 8


def _choose_pack(input_dim, latent_dim, cap):
    """Smallest power of two making the mu store ~512 lanes and z >=128."""
    pack = 1
    while pack < cap and (pack * input_dim < 512 or pack * latent_dim < 128):
        pack *= 2
    return max(1, min(pack, cap))


# ---------------------------------------------------------------------------
# Kernel: a plain fused MLP over one batch tile.  All layout tricks (row
# packing, concat fusion, affine folding) are done in the wrapper, so the
# kernel body is just matmul + bias (+ optional ReLU) chains.
# ---------------------------------------------------------------------------
def _make_decoder_kernel(n_layers: int, non_linear: bool, compute_dtype):
    def kernel(z_ref, c_ref, *refs):
        # refs = [W0_z, W0_c, b0, W1, b1, ..., W_{L-1}, b_{L-1}, mu_out]
        mu_ref = refs[-1]
        params = refs[:-1]

        w0z, w0c, b0 = params[0], params[1], params[2]
        x = (jnp.dot(z_ref[...], w0z[...], preferred_element_type=jnp.float32)
             + jnp.dot(c_ref[...], w0c[...], preferred_element_type=jnp.float32)
             + b0[...])
        if non_linear and n_layers > 1:          # ReLU after hidden layers only
            x = jnp.maximum(x, 0.0)

        idx = 3
        for l in range(1, n_layers):
            w = params[idx][...]
            b = params[idx + 1][...]
            idx += 2
            x = jnp.dot(x.astype(compute_dtype), w,
                        preferred_element_type=jnp.float32) + b
            if non_linear and l < n_layers - 1:  # no ReLU after the mean layer
                x = jnp.maximum(x, 0.0)

        mu_ref[...] = x.astype(mu_ref.dtype)

    return kernel


# ---------------------------------------------------------------------------
# Factory: one-time parameter preprocessing + a jitted per-call forward.
# ---------------------------------------------------------------------------
def make_decoder_forward(weights, biases, logvar, latent_dim, *,
                         non_linear=False, use_bf16=False, pack=None,
                         max_batch_rows=8192):
    """Returns forward(z, c) -> (mu, scale).

    `weights[i]` has shape (in, out) (transpose of the PyTorch layout),
    `biases[i]` has shape (1, out), `logvar` has shape (1, input_dim).
    All packing / folding happens here, once, not per call.
    """
    weights = [jnp.asarray(w, jnp.float32) for w in weights]
    biases = [jnp.asarray(b, jnp.float32).reshape(1, -1) for b in biases]
    input_dim = int(weights[-1].shape[1])
    c_dim = int(weights[0].shape[0]) - int(latent_dim)
    latent_dim = int(latent_dim)

    # non_linear=False (module default): the layer chain is affine -> fold into
    # a single (D0, input_dim) weight + bias and emit one matmul.
    if not non_linear:
        w_fold, b_fold = weights[0], biases[0]
        for w, b in zip(weights[1:], biases[1:]):
            b_fold = b_fold @ w + b
            w_fold = w_fold @ w
        weights, biases = [w_fold], [b_fold]
    n_layers = len(weights)

    if pack is None:
        pack = _choose_pack(input_dim, latent_dim, _device_pack_cap())
    pack = max(1, int(pack))

    compute_dtype = jnp.bfloat16 if use_bf16 else jnp.float32
    act_itemsize = jnp.dtype(compute_dtype).itemsize

    # Fuse torch.cat([z, c], dim=1): split the first weight's rows instead.
    w0 = weights[0]
    w0_z, w0_c = w0[:latent_dim], w0[latent_dim:]

    # Lane-dense I/O: fold `pack` consecutive batch rows into one lane-row
    # (free row-major reshapes outside; block-diagonal weights inside).
    def pack_w(w):
        wp = w if pack == 1 else jnp.kron(jnp.eye(pack, dtype=w.dtype), w)
        return wp.astype(compute_dtype)

    def pack_b(b):
        return b if pack == 1 else jnp.tile(b, (1, pack))   # stays f32

    flat_params = [pack_w(w0_z), pack_w(w0_c), pack_b(biases[0])]
    for w, b in zip(weights[1:], biases[1:]):
        flat_params += [pack_w(w), pack_b(b)]
    flat_params = tuple(flat_params)

    packed_weights = [flat_params[0], flat_params[1]] + list(flat_params[3::2])
    macs_per_row = sum(int(p.shape[0]) * int(p.shape[1]) for p in packed_weights)
    param_bytes = sum(int(p.size) * p.dtype.itemsize for p in flat_params)

    # scale is a tiny constant (1, input_dim) op; compute it once here.
    scale = jnp.exp(jnp.asarray(logvar, jnp.float32)).reshape(1, -1) ** 0.5

    kernel = _make_decoder_kernel(n_layers, non_linear, compute_dtype)
    cap_rows = max(8, (max_batch_rows // pack) // 8 * 8)   # packed-row tile cap

    @jax.jit
    def forward(z, c):
        B = z.shape[0]
        z = z.astype(compute_dtype)
        c2 = c.reshape(-1, c_dim).astype(compute_dtype)

        # Tiling in packed-row space.  Keep the grid at >=2 (>=4 for larger
        # batches) steps so read-DMA / write-DMA overlap and the "parallel"
        # axis can shard across both v7x TensorCores; cap the tile so the
        # per-step DMA comfortably amortizes the ~0.35 us step overhead.
        rows = _cdiv(B, pack)
        if rows < 16:
            bt_rows, rows_pad = rows, rows          # single full-array block
        else:
            target_steps = 4 if rows >= 64 else 2
            bt_rows = min(cap_rows, _round_up(_cdiv(rows, target_steps), 8))
            bt_rows = max(8, bt_rows)
            rows_pad = _round_up(rows, bt_rows)
        n_steps = rows_pad // bt_rows
        B_pad = rows_pad * pack

        if B_pad > B:
            z = jnp.pad(z, ((0, B_pad - B), (0, 0)))
            c2 = jnp.pad(c2, ((0, B_pad - B), (0, 0)))
        z_p = z.reshape(rows_pad, pack * latent_dim)    # free row-major reshape
        c_p = c2.reshape(rows_pad, pack * c_dim)

        in_specs = [
            pl.BlockSpec((bt_rows, pack * latent_dim), lambda i: (i, 0)),
            pl.BlockSpec((bt_rows, pack * c_dim), lambda i: (i, 0)),
        ] + [pl.BlockSpec(p.shape, lambda i: (0, 0)) for p in flat_params]

        out_spec = pl.BlockSpec((bt_rows, pack * input_dim), lambda i: (i, 0))
        out_shape = jax.ShapeDtypeStruct((rows_pad, pack * input_dim),
                                         jnp.float32)

        # Advisory cost estimate (packed shapes, consistent with the kernel).
        bytes_accessed = (act_itemsize * rows_pad * pack * (latent_dim + c_dim)
                          + 4 * rows_pad * pack * input_dim + param_bytes)
        cost = pl.CostEstimate(flops=2 * rows_pad * macs_per_row,
                               transcendentals=0,
                               bytes_accessed=int(bytes_accessed))

        # VMEM budget: double-buffered tiles + params (+ margin).
        tile_bytes = (bt_rows * pack * (latent_dim + c_dim) * act_itemsize
                      + bt_rows * pack * input_dim * 4)
        vmem_limit = int(min(100 << 20,
                             max(16 << 20, 2 * tile_bytes + 2 * param_bytes
                                 + (2 << 20))))

        mu_p = pl.pallas_call(
            kernel,
            grid=(n_steps,),
            in_specs=in_specs,
            out_specs=out_spec,
            out_shape=out_shape,
            compiler_params=pltpu.CompilerParams(
                dimension_semantics=("parallel",),
                vmem_limit_bytes=vmem_limit),
            cost_estimate=cost,
        )(z_p, c_p, *flat_params)

        mu = mu_p.reshape(B_pad, input_dim)             # free row-major reshape
        if B_pad > B:
            mu = mu[:B]
        return mu, scale

    return forward


# ---------------------------------------------------------------------------
# Deterministic parameter construction (mirrors Decoder.__init__ shapes)
# ---------------------------------------------------------------------------
def init_decoder_params(key, input_dim, hidden_dim, c_dim, init_logvar=-3.0):
    hidden_dims = hidden_dim[::-1]
    layer_sizes = list(hidden_dims) + [input_dim]
    layer_sizes[0] = hidden_dims[0] + c_dim

    weights, biases = [], []
    for d0, d1 in zip(layer_sizes[:-1], layer_sizes[1:]):
        key, kw, kb = jax.random.split(key, 3)
        bound = 1.0 / jnp.sqrt(d0)
        # stored as (in, out): transpose of PyTorch's (out, in) weight
        w = jax.random.uniform(kw, (d0, d1), jnp.float32, -bound, bound)
        b = jax.random.uniform(kb, (1, d1), jnp.float32, -bound, bound)
        weights.append(w)
        biases.append(b)

    logvar = jnp.full((1, input_dim), init_logvar, dtype=jnp.float32)
    return weights, biases, logvar


def reference_forward(z, c, weights, biases, logvar, non_linear=False):
    x = jnp.concatenate([z, c.reshape(-1, c.shape[-1])], axis=1)
    for w, b in zip(weights[:-1], biases[:-1]):
        x = x @ w + b
        if non_linear:
            x = jnp.maximum(x, 0.0)
    mu = x @ weights[-1] + biases[-1]
    scale = jnp.exp(logvar) ** 0.5
    return mu, scale


# ---------------------------------------------------------------------------
if __name__ == "__main__":
    # Shapes consistent with the module:
    #   hidden_dim=[32, 16] -> reversed [16, 32]; latent dim = 16
    #   c_dim=4; input_dim=64
    input_dim, hidden_dim, c_dim = 64, [32, 16], 4
    latent_dim = hidden_dim[::-1][0]  # 16

    key = jax.random.PRNGKey(0)
    key, kz1, kc1, kz2, kc2, kz3, kc3 = jax.random.split(key, 7)
    weights, biases, logvar = init_decoder_params(
        key, input_dim, hidden_dim, c_dim, init_logvar=-3.0)

    # Case 1: non_linear=True (exercises the ReLU / multi-layer path).
    fwd_nl = make_decoder_forward(weights, biases, logvar, latent_dim,
                                  non_linear=True)
    B1 = 8
    z1 = jax.random.normal(kz1, (B1, latent_dim), jnp.float32)
    c1 = jax.random.normal(kc1, (B1, c_dim), jnp.float32)
    mu1, scale1 = fwd_nl(z1, c1)
    jax.block_until_ready((mu1, scale1))
    mu1_ref, scale1_ref = reference_forward(z1, c1, weights, biases, logvar,
                                            non_linear=True)
    assert mu1.shape == (B1, input_dim) and scale1.shape == (1, input_dim)
    assert jnp.allclose(mu1, mu1_ref, atol=1e-4, rtol=1e-4)
    assert jnp.allclose(scale1, scale1_ref, atol=1e-6, rtol=1e-6)

    # Case 2: module default non_linear=False (affine fold) with a batch size
    # that exercises the padding / tail-slice path.
    fwd_lin = make_decoder_forward(weights, biases, logvar, latent_dim,
                                   non_linear=False)
    B2 = 7
    z2 = jax.random.normal(kz2, (B2, latent_dim), jnp.float32)
    c2 = jax.random.normal(kc2, (B2, c_dim), jnp.float32)
    mu2, scale2 = fwd_lin(z2, c2)
    jax.block_until_ready((mu2, scale2))
    mu2_ref, scale2_ref = reference_forward(z2, c2, weights, biases, logvar,
                                            non_linear=False)
    assert mu2.shape == (B2, input_dim) and scale2.shape == (1, input_dim)
    assert jnp.allclose(mu2, mu2_ref, atol=1e-4, rtol=1e-4)
    assert jnp.allclose(scale2, scale2_ref, atol=1e-6, rtol=1e-6)

    # Case 3: larger batch -> multi-step grid (read/write DMA overlap,
    # megacore-shardable "parallel" axis) plus row padding.
    B3 = 160
    z3 = jax.random.normal(kz3, (B3, latent_dim), jnp.float32)
    c3 = jax.random.normal(kc3, (B3, c_dim), jnp.float32)
    mu3, scale3 = fwd_lin(z3, c3)
    jax.block_until_ready((mu3, scale3))
    mu3_ref, _ = reference_forward(z3, c3, weights, biases, logvar,
                                   non_linear=False)
    assert mu3.shape == (B3, input_dim)
    assert jnp.allclose(mu3, mu3_ref, atol=1e-4, rtol=1e-4)

    # Case 4: bf16 operand path (HBM-traffic reduction for v6e/v5e); f32
    # accumulation + f32 mu, so only operand rounding error (loose tolerance).
    fwd_bf16 = make_decoder_forward(weights, biases, logvar, latent_dim,
                                    non_linear=True, use_bf16=True)
    mu4, scale4 = fwd_bf16(z1, c1)
    jax.block_until_ready((mu4, scale4))
    assert mu4.shape == (B1, input_dim)
    assert jnp.allclose(mu4, mu1_ref, atol=1e-1, rtol=1e-1)
    assert jnp.allclose(scale4, scale1_ref, atol=1e-6, rtol=1e-6)

    # TODO(synk): the torch.distributions.Normal wrapper itself (sampling /
    # log_prob) is a host-side object, not kernel compute; we return its
    # (loc, scale) parameters instead.
    print("KERNEL_OK")
</pallas_src>

<mosaic_0001>
module attributes {stable_mosaic.version = 11 : i64} {
  func.func @kernel(%arg0: i32, %arg1: memref<1x128xf32, #tpu.memory_space<vmem>>, %arg2: memref<1x32xf32, #tpu.memory_space<vmem>>, %arg3: memref<128x256xf32, #tpu.memory_space<vmem>>, %arg4: memref<32x256xf32, #tpu.memory_space<vmem>>, %arg5: memref<1x256xf32, #tpu.memory_space<vmem>>, %arg6: memref<256x512xf32, #tpu.memory_space<vmem>>, %arg7: memref<1x512xf32, #tpu.memory_space<vmem>>, %arg8: memref<1x512xf32, #tpu.memory_space<vmem>>) attributes {dimension_semantics = [#tpu.dimension_semantics<parallel>], iteration_bounds = array<i64: 1>, scalar_prefetch = 0 : i64, scratch_operands = 0 : i64, tpu.core_type = #tpu.core_type<tc>, window_params = [{transform_indices = @transform_0, window_bounds = array<i64: 1, 128>}, {transform_indices = @transform_1, window_bounds = array<i64: 1, 32>}, {pipeline_mode = #tpu.pipeline_mode<synchronous>, transform_indices = @transform_2, window_bounds = array<i64: 128, 256>}, {pipeline_mode = #tpu.pipeline_mode<synchronous>, transform_indices = @transform_3, window_bounds = array<i64: 32, 256>}, {pipeline_mode = #tpu.pipeline_mode<synchronous>, transform_indices = @transform_4, window_bounds = array<i64: 1, 256>}, {pipeline_mode = #tpu.pipeline_mode<synchronous>, transform_indices = @transform_5, window_bounds = array<i64: 256, 512>}, {pipeline_mode = #tpu.pipeline_mode<synchronous>, transform_indices = @transform_6, window_bounds = array<i64: 1, 512>}, {transform_indices = @transform_7, window_bounds = array<i64: 1, 512>}]} {
    %c0 = arith.constant 0 : index
    %c0_0 = arith.constant 0 : index
    %0 = vector.load %arg1[%c0, %c0_0] : memref<1x128xf32, #tpu.memory_space<vmem>>, vector<1x128xf32>
    %c0_1 = arith.constant 0 : index
    %c0_2 = arith.constant 0 : index
    %1 = vector.load %arg3[%c0_1, %c0_2] : memref<128x256xf32, #tpu.memory_space<vmem>>, vector<128x256xf32>
    %cst = arith.constant dense<0.000000e+00> : vector<1x256xf32>
    %2 = tpu.matmul %0, %1, %cst {dimension_numbers = #tpu.dot_dimension_numbers<[1], [0], [0], [1], [0, 0, 1, 1], [], []>} : vector<1x128xf32>, vector<128x256xf32>, vector<1x256xf32> -> vector<1x256xf32>
    %c0_3 = arith.constant 0 : index
    %c0_4 = arith.constant 0 : index
    %3 = vector.load %arg2[%c0_3, %c0_4] : memref<1x32xf32, #tpu.memory_space<vmem>>, vector<1x32xf32>
    %c0_5 = arith.constant 0 : index
    %c0_6 = arith.constant 0 : index
    %4 = vector.load %arg4[%c0_5, %c0_6] : memref<32x256xf32, #tpu.memory_space<vmem>>, vector<32x256xf32>
    %cst_7 = arith.constant dense<0.000000e+00> : vector<1x256xf32>
    %5 = tpu.matmul %3, %4, %cst_7 {dimension_numbers = #tpu.dot_dimension_numbers<[1], [0], [0], [1], [0, 0, 1, 1], [], []>} : vector<1x32xf32>, vector<32x256xf32>, vector<1x256xf32> -> vector<1x256xf32>
    %6 = arith.addf %2, %5 : vector<1x256xf32>
    %c0_8 = arith.constant 0 : index
    %c0_9 = arith.constant 0 : index
    %7 = vector.load %arg5[%c0_8, %c0_9] : memref<1x256xf32, #tpu.memory_space<vmem>>, vector<1x256xf32>
    %8 = arith.addf %6, %7 : vector<1x256xf32>
    %cst_10 = arith.constant 0.000000e+00 : f32
    %9 = vector.broadcast %cst_10 : f32 to vector<1x256xf32>
    %10 = arith.maximumf %8, %9 : vector<1x256xf32>
    %c0_11 = arith.constant 0 : index
    %c0_12 = arith.constant 0 : index
    %11 = vector.load %arg6[%c0_11, %c0_12] : memref<256x512xf32, #tpu.memory_space<vmem>>, vector<256x512xf32>
    %c0_13 = arith.constant 0 : index
    %c0_14 = arith.constant 0 : index
    %12 = vector.load %arg7[%c0_13, %c0_14] : memref<1x512xf32, #tpu.memory_space<vmem>>, vector<1x512xf32>
    %cst_15 = arith.constant dense<0.000000e+00> : vector<1x512xf32>
    %13 = tpu.matmul %10, %11, %cst_15 {dimension_numbers = #tpu.dot_dimension_numbers<[1], [0], [0], [1], [0, 0, 1, 1], [], []>} : vector<1x256xf32>, vector<256x512xf32>, vector<1x512xf32> -> vector<1x512xf32>
    %14 = arith.addf %13, %12 : vector<1x512xf32>
    %c0_16 = arith.constant 0 : index
    %c0_17 = arith.constant 0 : index
    %15 = vector.load %arg8[%c0_16, %c0_17] : memref<1x512xf32, #tpu.memory_space<vmem>>, vector<1x512xf32>
    tpu.vector_store %arg8[%c0_16, %c0_17], %14 {strides = array<i32>} : memref<1x512xf32, #tpu.memory_space<vmem>>, vector<1x512xf32>,
    return
  }
  func.func @transform_0(%arg0: i32) -> (i32, i32) {
    %c0_i32 = arith.constant 0 : i32
    %c0_i32_0 = arith.constant 0 : i32
    return %arg0, %c0_i32 : i32, i32
  }
  func.func @transform_1(%arg0: i32) -> (i32, i32) {
    %c0_i32 = arith.constant 0 : i32
    %c0_i32_0 = arith.constant 0 : i32
    return %arg0, %c0_i32 : i32, i32
  }
  func.func @transform_2(%arg0: i32) -> (i32, i32) {
    %c0_i32 = arith.constant 0 : i32
    %c0_i32_0 = arith.constant 0 : i32
    %c0_i32_1 = arith.constant 0 : i32
    return %c0_i32, %c0_i32_0 : i32, i32
  }
  func.func @transform_3(%arg0: i32) -> (i32, i32) {
    %c0_i32 = arith.constant 0 : i32
    %c0_i32_0 = arith.constant 0 : i32
    %c0_i32_1 = arith.constant 0 : i32
    return %c0_i32, %c0_i32_0 : i32, i32
  }
  func.func @transform_4(%arg0: i32) -> (i32, i32) {
    %c0_i32 = arith.constant 0 : i32
    %c0_i32_0 = arith.constant 0 : i32
    %c0_i32_1 = arith.constant 0 : i32
    return %c0_i32, %c0_i32_0 : i32, i32
  }
  func.func @transform_5(%arg0: i32) -> (i32, i32) {
    %c0_i32 = arith.constant 0 : i32
    %c0_i32_0 = arith.constant 0 : i32
    %c0_i32_1 = arith.constant 0 : i32
    return %c0_i32, %c0_i32_0 : i32, i32
  }
  func.func @transform_6(%arg0: i32) -> (i32, i32) {
    %c0_i32 = arith.constant 0 : i32
    %c0_i32_0 = arith.constant 0 : i32
    %c0_i32_1 = arith.constant 0 : i32
    return %c0_i32, %c0_i32_0 : i32, i32
  }
  func.func @transform_7(%arg0: i32) -> (i32, i32) {
    %c0_i32 = arith.constant 0 : i32
    %c0_i32_0 = arith.constant 0 : i32
    return %arg0, %c0_i32 : i32, i32
  }
}

</mosaic_0001>

<bundles_post_ra>
// kernel: forward.1
= control target key start
LH: loop header
LB: loop body
LE: loop exit
PB: predicated region body
PF: predicated region fallthrough
CT: control target
= control target key end

     0   :  { %12 = vsyncpa [#allocation3], 0  ;;  %s960_s0 = inlined_call_operand.vmem [shape: f32[1,128], index: 0, kind: input, shape index: {}]   ;;  %s961_s1 = inlined_call_operand.vmem [shape: f32[1,32], index: 1, kind: input, shape index: {}]   ;;  %s962_s2 = inlined_call_operand.hbm [shape: f32[128,256], index: 2, kind: input, shape index: {}]   ;;  %s963_s3 = inlined_call_operand.hbm [shape: f32[32,256], index: 3, kind: input, shape index: {}]   ;;  %s964_s4 = inlined_call_operand.vmem [shape: f32[1,256], index: 4, kind: input, shape index: {}]   ;;  %s965_s5 = inlined_call_operand.hbm [shape: f32[256,512], index: 5, kind: input, shape index: {}]   ;;  %s966_s6 = inlined_call_operand.vmem [shape: f32[1,512], index: 6, kind: input, shape index: {}]   ;;  %s967_s7 = inlined_call_operand.vmem [shape: f32[1,512], index: 7, kind: output, shape index: {}]  }
   0x1   :  { %13 = vsyncpa [#allocation5], 0  ;;  %s853_s24 = smov [#allocation4]   ;;  %s854_s26 = smov [#allocation2]  }
   0x2   :  { %s35_s25 = sshll.u32 %s853_s24, 4  ;;  %s23_s27 = sshll.u32 %s854_s26, 4  ;;  %s36_s25 = int_to_ptr.vmem [resolvable:$true] %s35_s25  ;;  %s902_s27 = int_to_ptr.vmem [resolvable:$true] %s23_s27 }
   0x3   :  { %s783_s30 = scalar_lea.hbm %s963_s3, 1024 }
   0x4   :  { %p784_p0 = scmp.ne.s32.totalorder %s963_s3, %s783_s30  ;;  %p787_p1 = scmp.lt.u32.totalorder %s783_s30, %s963_s3 }
   0x6   :  { %p789_p2 = pnand %p787_p1, %p784_p0 }
   0x8   :  { %792 = shalt.err (!%p789_p2)
}
   0x9   :  { %s793_s12 = scalar_lea.vmem %s36_s25, 1024  ;;  %p798_p4 = scmp.lt.s32.totalorder %s36_s25, %s36_s25 }
   0xa   :  { %p794_p3 = scmp.ne.s32.totalorder %s36_s25, %s793_s12  ;;  %p799_p5 = scmp.lt.s32.totalorder %s793_s12, %s793_s12 }
   0xc   :  { %p800_p6 = por %p799_p5, %p798_p4 }
   0xe   :  { %p801_p7 = pnand %p800_p6, %p794_p3 }
  0x10   :  { %804 = shalt.err (!%p801_p7)
}
  0x11   :  { %s855_s13 = smov 256   ;;  %s856_s14 = smov 16  }
  0x12   :  { %41 = dma.hbm_to_vmem [thread:$0]  %s963_s3, 1024, %s36_s25, [#allocation5], %s855_s13, %s855_s13, %s856_s14  }
  0x13   :  { %s805_s19 = scalar_lea.hbm %s962_s2, 4096 }
  0x14   :  { %p806_p8 = scmp.ne.s32.totalorder %s962_s2, %s805_s19  ;;  %p809_p9 = scmp.lt.u32.totalorder %s805_s19, %s962_s2 }
  0x16   :  { %p811_p10 = pnand %p809_p9, %p806_p8 }
  0x18   :  { %814 = shalt.err (!%p811_p10)
}
  0x19   :  { %s815_s24 = scalar_lea.vmem %s902_s27, 4096  ;;  %p820_p12 = scmp.lt.s32.totalorder %s902_s27, %s902_s27 }
  0x1a   :  { %p816_p11 = scmp.ne.s32.totalorder %s902_s27, %s815_s24  ;;  %p821_p13 = scmp.lt.s32.totalorder %s815_s24, %s815_s24 }
  0x1c   :  { %p822_p0 = por %p821_p13, %p820_p12 }
  0x1e   :  { %p823_p1 = pnand %p822_p0, %p816_p11 }
  0x20   :  { %826 = shalt.err (!%p823_p1)
}
  0x21   :  { %29 = dma.hbm_to_vmem [thread:$0]  %s962_s2, 4096, %s902_s27, [#allocation3], %s855_s13, %s855_s13, %s856_s14  }
  0x22   :  { %s857_s26 = smov [#allocation6]   ;;  %s827_s8 = scalar_lea.hbm %s965_s5, 16384 }
  0x23   :  { %s49_s28 = sshll.u32 %s857_s26, 4  ;;  %p828_p2 = scmp.ne.s32.totalorder %s965_s5, %s827_s8  ;;  %s50_s28 = int_to_ptr.vmem [resolvable:$true] %s49_s28 }
  0x24   :  { %p831_p3 = scmp.lt.u32.totalorder %s827_s8, %s965_s5 }
  0x26   :  { %p833_p4 = pnand %p831_p3, %p828_p2 }
  0x28   :  { %836 = shalt.err (!%p833_p4)
}
  0x29   :  { %s837_s15 = scalar_lea.vmem %s50_s28, 16384  ;;  %p842_p6 = scmp.lt.s32.totalorder %s50_s28, %s50_s28 }
  0x2a   :  { %p838_p5 = scmp.ne.s32.totalorder %s50_s28, %s837_s15  ;;  %p843_p7 = scmp.lt.s32.totalorder %s837_s15, %s837_s15 }
  0x2c   :  { %p844_p8 = por %p843_p7, %p842_p6 }
  0x2e   :  { %p845_p9 = pnand %p844_p8, %p838_p5 }
  0x30   :  { %848 = shalt.err (!%p845_p9)
}
  0x31   :  { %s858_s2 = smov 512   ;;  %s859_s27 = smov 32  }
  0x32   :  { %55 = dma.hbm_to_vmem [thread:$0]  %s965_s5, 16384, %s50_s28, [#allocation5], %s858_s2, %s858_s2, %s859_s27  }
  0x33   :  { %849 = dma.done.wait [#allocation3], 4096  }
  0x34   :  { %850 = vsyncadd [#allocation3], 4294963200 }
  0x35   :  { %851 = dma.done.wait [#allocation5], 17408  }
  0x36   :  { %852 = vsyncadd [#allocation5], 4294949888  ;;  %v860_v0 = vmov 0.0   ;;  %v69_v1 = vld [vmem:[#allocation2 + $0x8] sm:$0xff]  ;;  %v71_v2 = vld [vmem:[#allocation2 + $0x18] sm:$0xff]  ;;  %vm109_vm0 = vcmask 261120  }
  0x37   :  { %177 = vmatprep.mubr.f32.mxu1 %v860_v0  ;;  %248 = vmatprep.mubr.f32.mxu0 %v860_v0  ;;  %v68_v3 = vld [vmem:[#allocation2] sm:$0xff]  ;;  %v612_v4 = vpack.c.bf16 %v71_v2, %v69_v1  ;;  %v70_v5 = vld [vmem:[#allocation2 + $0x10] sm:$0xff]  ;;  %v73_v6 = vld [vmem:[#allocation2 + $0x28] sm:$0xff] }
  0x38   :  { %v75_v7 = vld [vmem:[#allocation2 + $0x38] sm:$0xff]  ;;  %v614_v8 = vpack.c.bf16 %v70_v5, %v68_v3  ;;  %v72_v10 = vld [vmem:[#allocation2 + $0x20] sm:$0xff]  ;;  %v74_v11 = vld [vmem:[#allocation2 + $0x30] sm:$0xff] }
  0x39   :  { %v616_v9 = vpack.c.bf16 %v75_v7, %v73_v6  ;;  %v77_v12 = vld [vmem:[#allocation2 + $0x48] sm:$0xff]  ;;  %613 = vmatprep.subr.bf16.mxu0 %v612_v4  ;;  %v79_v13 = vld [vmem:[#allocation2 + $0x58] sm:$0xff]  ;;  %v618_v14 = vpack.c.bf16 %v74_v11, %v72_v10  ;;  %v76_v16 = vld [vmem:[#allocation2 + $0x40] sm:$0xff] }
  0x3a   :  { %615 = vmatpush1.bf16.msra.mxu0 %v614_v8  ;;  %v620_v15 = vpack.c.bf16 %v79_v13, %v77_v12  ;;  %v78_v17 = vld [vmem:[#allocation2 + $0x50] sm:$0xff]  ;;  %v81_v18 = vld [vmem:[#allocation2 + $0x68] sm:$0xff]  ;;  %v83_v19 = vld [vmem:[#allocation2 + $0x78] sm:$0xff] }
  0x3b   :  { %617 = vmatprep.subr.bf16.mxu0 %v616_v9  ;;  %v622_v20 = vpack.c.bf16 %v78_v17, %v76_v16  ;;  %v102_v21 = vld [vmem:[#allocation4 + $0x8] sm:$0xff]  ;;  %v104_v22 = vld [vmem:[#allocation4 + $0x18] sm:$0xff]  ;;  %v101_v23 = vld [vmem:[#allocation4] sm:$0xff]  ;;  %v624_v24 = vpack.c.bf16 %v83_v19, %v81_v18 }
  0x3c   :  { %v80_v25 = vld [vmem:[#allocation2 + $0x60] sm:$0xff]  ;;  %v82_v26 = vld [vmem:[#allocation2 + $0x70] sm:$0xff]  ;;  %v604_v27 = vpack.c.bf16 %v104_v22, %v102_v21  ;;  %v85_v29 = vld [vmem:[#allocation2 + $0x88] sm:$0xff] }
  0x3d   :  { %v103_v28 = vld [vmem:[#allocation4 + $0x10] sm:$0xff]  ;;  %v87_v30 = vld [vmem:[#allocation2 + $0x98] sm:$0xff]  ;;  %v106_v32 = vld [vmem:[#allocation4 + $0x28] sm:$0xff]  ;;  %v626_v36 = vpack.c.bf16 %v82_v26, %v80_v25 }
  0x3e   :  { %619 = vmatpush1.bf16.msra.mxu0 %v618_v14  ;;  %v606_v31 = vpack.c.bf16 %v103_v28, %v101_v23  ;;  %605 = vmatprep.subr.bf16.mxu1 %v604_v27  ;;  %v108_v33 = vld [vmem:[#allocation4 + $0x38] sm:$0xff]  ;;  %v105_v34 = vld [vmem:[#allocation4 + $0x20] sm:$0xff]  ;;  %v107_v35 = vld [vmem:[#allocation4 + $0x30] sm:$0xff]  ;;  %v628_v39 = vpack.c.bf16 %v87_v30, %v85_v29 }
  0x3f   :  { %621 = vmatprep.subr.bf16.mxu0 %v620_v15  ;;  %v608_v37 = vpack.c.bf16 %v108_v33, %v106_v32  ;;  %v610_v38 = vpack.c.bf16 %v107_v35, %v105_v34  ;;  %v84_v40 = vld [vmem:[#allocation2 + $0x80] sm:$0xff]  ;;  %v86_v41 = vld [vmem:[#allocation2 + $0x90] sm:$0xff]  ;;  %v89_v42 = vld [vmem:[#allocation2 + $0xa8] sm:$0xff] }
  0x40   :  { %607 = vmatpush1.bf16.msra.mxu1 %v606_v31  ;;  %v91_v43 = vld [vmem:[#allocation2 + $0xb8] sm:$0xff]  ;;  %v272_v44 = vld [vmem:[#allocation6 + $0x8] sm:$0xff]  ;;  %v271_v47 = vld [vmem:[#allocation6] sm:$0xff]  ;;  %v630_v49 = vpack.c.bf16 %v86_v41, %v84_v40 }
  0x41   :  { %609 = vmatprep.subr.bf16.mxu1 %v608_v37  ;;  %v276_v45 = vld [vmem:[#allocation6 + $0x28] sm:$0xff]  ;;  %v275_v48 = vld [vmem:[#allocation6 + $0x20] sm:$0xff]  ;;  %v632_v54 = vpack.c.bf16 %v91_v43, %v89_v42  ;;  %v90_v55 = vld [vmem:[#allocation2 + $0xb0] sm:$0xff] }
  0x42   :  { %623 = vmatpush1.bf16.msra.mxu0 %v622_v20  ;;  %v644_v46 = vpack.c.bf16 %v276_v45, %v272_v44  ;;  %v88_v50 = vld [vmem:[#allocation2 + $0xa0] sm:$0xff]  ;;  %v646_v52 = vpack.c.bf16 %v275_v48, %v271_v47  ;;  %v280_v53 = vld [vmem:[#allocation6 + $0x48] sm:$0xff]  ;;  %v95_v58 = vld [vmem:[#allocation2 + $0xd8] sm:$0xff] }
  0x43   :  { %625 = vmatprep.subr.bf16.mxu0 %v624_v24  ;;  %v100_v51 = vld [vmem:[%s961_s1] sm:$0x1]  ;;  %v93_v56 = vld [vmem:[#allocation2 + $0xc8] sm:$0xff]  ;;  %v634_v0 = vpack.c.bf16 %v90_v55, %v88_v50  ;;  %v94_v2 = vld [vmem:[#allocation2 + $0xd0] sm:$0xff] }
  0x44   :  { %611 = vmatpush1.bf16.msra.mxu1 %v610_v38  ;;  %v284_v57 = vld [vmem:[#allocation6 + $0x68] sm:$0xff]  ;;  %v279_v60 = vld [vmem:[#allocation6 + $0x40] sm:$0xff]  ;;  %v636_v4 = vpack.c.bf16 %v95_v58, %v93_v56  ;;  %v99_v9 = vld [vmem:[#allocation2 + $0xf8] sm:$0xff] }
  0x45   :  { %645 = vmatprep.subr.bf16.mxu1 %v644_v46  ;;  %v648_v59 = vpack.c.bf16 %v284_v57, %v280_v53  ;;  %v283_v61 = vld [vmem:[#allocation6 + $0x60] sm:$0xff]  ;;  %v288_v62 = vld [vmem:[#allocation6 + $0x88] sm:$0xff]  ;;  %v98_v14 = vld [vmem:[#allocation2 + $0xf0] sm:$0xff] }
  0x46   :  { %627 = vmatpush1.bf16.msra.mxu0 %v626_v36  ;;  %v292_v63 = vld [vmem:[#allocation6 + $0xa8] sm:$0xff]  ;;  %v92_v1 = vld [vmem:[#allocation2 + $0xc0] sm:$0xff]  ;;  %v650_v3 = vpack.c.bf16 %v283_v61, %v279_v60  ;;  %v274_v17 = vld [vmem:[#allocation6 + $0x18] sm:$0xff] }
  0x47   :  { %629 = vmatprep.subr.bf16.mxu0 %v628_v39  ;;  %603 = vmatmul.mubr.msk.f32.vlgmr.msra.gmra.mrb[0].mxu1 %vm109_vm0, %v100_v51  ;;  %v97_v5 = vld [vmem:[#allocation2 + $0xe8] sm:$0xff]  ;;  %v652_v6 = vpack.c.bf16 %v292_v63, %v288_v62  ;;  %v287_v7 = vld [vmem:[#allocation6 + $0x80] sm:$0xff]  ;;  %v638_v12 = vpack.c.bf16 %v94_v2, %v92_v1  ;;  %v278_v21 = vld [vmem:[#allocation6 + $0x38] sm:$0xff] }
  0x48   :  { %647 = vmatpush1.bf16.msra.mxu1 %v646_v52  ;;  %v291_v8 = vld [vmem:[#allocation6 + $0xa0] sm:$0xff]  ;;  %v296_v10 = vld [vmem:[#allocation6 + $0xc8] sm:$0xff]  ;;  %v640_v16 = vpack.c.bf16 %v99_v9, %v97_v5  ;;  %v273_v25 = vld [vmem:[#allocation6 + $0x10] sm:$0xff]  ;;  %v708_v28 = vpack.c.bf16 %v278_v21, %v274_v17 }
  0x49   :  { %649 = vmatprep.subr.bf16.mxu1 %v648_v59  ;;  %v300_v11 = vld [vmem:[#allocation6 + $0xe8] sm:$0xff]  ;;  %v96_v13 = vld [vmem:[#allocation2 + $0xe0] sm:$0xff]  ;;  %v654_v15 = vpack.c.bf16 %v291_v8, %v287_v7  ;;  %v277_v26 = vld [vmem:[#allocation6 + $0x30] sm:$0xff] }
  0x4a   :  { %631 = vmatpush1.bf16.msra.mxu0 %v630_v49  ;;  %v656_v18 = vpack.c.bf16 %v300_v11, %v296_v10  ;;  %v295_v19 = vld [vmem:[#allocation6 + $0xc0] sm:$0xff]  ;;  %v304_v22 = vld [vmem:[#allocation6 + $0x108] sm:$0xff]  ;;  %v642_v24 = vpack.c.bf16 %v98_v14, %v96_v13  ;;  %v282_v29 = vld [vmem:[#allocation6 + $0x58] sm:$0xff]  ;;  %v710_v37 = vpack.c.bf16 %v277_v26, %v273_v25 }
  0x4b   :  { %633 = vmatprep.subr.bf16.mxu0 %v632_v54  ;;  %v299_v20 = vld [vmem:[#allocation6 + $0xe0] sm:$0xff]  ;;  %v308_v23 = vld [vmem:[#allocation6 + $0x128] sm:$0xff]  ;;  %v286_v33 = vld [vmem:[#allocation6 + $0x78] sm:$0xff] }
  0x4c   :  { %651 = vmatpush1.bf16.msra.mxu1 %v650_v3  ;;  %v658_v27 = vpack.c.bf16 %v299_v20, %v295_v19  ;;  %v660_v30 = vpack.c.bf16 %v308_v23, %v304_v22  ;;  %v303_v31 = vld [vmem:[#allocation6 + $0x100] sm:$0xff]  ;;  %v312_v34 = vld [vmem:[#allocation6 + $0x148] sm:$0xff]  ;;  %v281_v38 = vld [vmem:[#allocation6 + $0x50] sm:$0xff]  ;;  %v712_v41 = vpack.c.bf16 %v286_v33, %v282_v29 }
  0x4d   :  { %653 = vmatprep.subr.bf16.mxu1 %v652_v6  ;;  %v307_v32 = vld [vmem:[#allocation6 + $0x120] sm:$0xff]  ;;  %v316_v35 = vld [vmem:[#allocation6 + $0x168] sm:$0xff]  ;;  %v285_v39 = vld [vmem:[#allocation6 + $0x70] sm:$0xff] }
  0x4e   :  { %635 = vmatpush1.bf16.msra.mxu0 %v634_v0  ;;  %v67_v36 = vld [vmem:[%s960_s0] sm:$0x1]  ;;  %v662_v40 = vpack.c.bf16 %v307_v32, %v303_v31  ;;  %v290_v42 = vld [vmem:[#allocation6 + $0x98] sm:$0xff]  ;;  %v664_v43 = vpack.c.bf16 %v316_v35, %v312_v34  ;;  %v320_v47 = vld [vmem:[#allocation6 + $0x188] sm:$0xff]  ;;  %v714_v49 = vpack.c.bf16 %v285_v39, %v281_v38 }
  0x4f   :  { %637 = vmatprep.subr.bf16.mxu0 %v636_v4  ;;  %v311_v44 = vld [vmem:[#allocation6 + $0x140] sm:$0xff]  ;;  %v294_v46 = vld [vmem:[#allocation6 + $0xb8] sm:$0xff]  ;;  %v324_v48 = vld [vmem:[#allocation6 + $0x1a8] sm:$0xff] }
  0x50   :  { %655 = vmatpush1.bf16.msra.mxu1 %v654_v15  ;;  %v315_v45 = vld [vmem:[#allocation6 + $0x160] sm:$0xff]  ;;  %v289_v50 = vld [vmem:[#allocation6 + $0x90] sm:$0xff]  ;;  %v716_v53 = vpack.c.bf16 %v294_v46, %v290_v42  ;;  %v298_v54 = vld [vmem:[#allocation6 + $0xd8] sm:$0xff]  ;;  %v668_v55 = vpack.c.bf16 %v324_v48, %v320_v47 }
  0x51   :  { %657 = vmatprep.subr.bf16.mxu1 %v656_v18  ;;  %v293_v51 = vld [vmem:[#allocation6 + $0xb0] sm:$0xff]  ;;  %v666_v52 = vpack.c.bf16 %v315_v45, %v311_v44  ;;  %v319_v56 = vld [vmem:[#allocation6 + $0x180] sm:$0xff]  ;;  %v302_v58 = vld [vmem:[#allocation6 + $0xf8] sm:$0xff] }
  0x52   :  { %639 = vmatpush1.bf16.msra.mxu0 %v638_v12  ;;  %v323_v57 = vld [vmem:[#allocation6 + $0x1a0] sm:$0xff]  ;;  %v328_v59 = vld [vmem:[#allocation6 + $0x1c8] sm:$0xff]  ;;  %v718_v61 = vpack.c.bf16 %v293_v51, %v289_v50  ;;  %v297_v62 = vld [vmem:[#allocation6 + $0xd0] sm:$0xff]  ;;  %v720_v1 = vpack.c.bf16 %v302_v58, %v298_v54 }
  0x53   :  { %641 = vmatprep.subr.bf16.mxu0 %v640_v16  ;;  %v332_v60 = vld [vmem:[#allocation6 + $0x1e8] sm:$0xff]  ;;  %v301_v63 = vld [vmem:[#allocation6 + $0xf0] sm:$0xff]  ;;  %v670_v0 = vpack.c.bf16 %v323_v57, %v319_v56  ;;  %v306_v2 = vld [vmem:[#allocation6 + $0x118] sm:$0xff] }
  0x54   :  { %659 = vmatpush1.bf16.msra.mxu1 %v658_v27  ;;  %v672_v3 = vpack.c.bf16 %v332_v60, %v328_v59  ;;  %v327_v4 = vld [vmem:[#allocation6 + $0x1c0] sm:$0xff]  ;;  %v310_v6 = vld [vmem:[#allocation6 + $0x138] sm:$0xff]  ;;  %v336_v7 = vld [vmem:[#allocation6 + $0x208] sm:$0xff]  ;;  %v722_v9 = vpack.c.bf16 %v301_v63, %v297_v62 }
  0x55   :  { %661 = vmatprep.subr.bf16.mxu1 %v660_v30  ;;  %v331_v5 = vld [vmem:[#allocation6 + $0x1e0] sm:$0xff]  ;;  %v340_v8 = vld [vmem:[#allocation6 + $0x228] sm:$0xff]  ;;  %v305_v10 = vld [vmem:[#allocation6 + $0x110] sm:$0xff]  ;;  %v724_v13 = vpack.c.bf16 %v310_v6, %v306_v2 }
  0x56   :  { %643 = vmatpush1.bf16.msra.mxu0 %v642_v24  ;;  %v309_v11 = vld [vmem:[#allocation6 + $0x130] sm:$0xff]  ;;  %v674_v12 = vpack.c.bf16 %v331_v5, %v327_v4  ;;  %v314_v14 = vld [vmem:[#allocation6 + $0x158] sm:$0xff]  ;;  %v676_v15 = vpack.c.bf16 %v340_v8, %v336_v7  ;;  %v335_v16 = vld [vmem:[#allocation6 + $0x200] sm:$0xff] }
  0x57   :  { %709 = vmatprep.subr.bf16.mxu0 %v708_v28  ;;  %v339_v17 = vld [vmem:[#allocation6 + $0x220] sm:$0xff]  ;;  %v318_v18 = vld [vmem:[#allocation6 + $0x178] sm:$0xff]  ;;  %v344_v19 = vld [vmem:[#allocation6 + $0x248] sm:$0xff]  ;;  %v726_v21 = vpack.c.bf16 %v309_v11, %v305_v10 }
  0x58   :  { %663 = vmatpush1.bf16.msra.mxu1 %v662_v40  ;;  %v348_v20 = vld [vmem:[#allocation6 + $0x268] sm:$0xff]  ;;  %v313_v22 = vld [vmem:[#allocation6 + $0x150] sm:$0xff]  ;;  %v678_v24 = vpack.c.bf16 %v339_v17, %v335_v16  ;;  %v728_v25 = vpack.c.bf16 %v318_v18, %v314_v14  ;;  %v322_v26 = vld [vmem:[#allocation6 + $0x198] sm:$0xff] }
  0x59   :  { %249 = vmatmul.mubr.f32.vlgmr.msra.gmra.mrb[0].mxu0 %v67_v36  ;;  %665 = vmatprep.subr.bf16.mxu1 %v664_v43  ;;  %v317_v23 = vld [vmem:[#allocation6 + $0x170] sm:$0xff]  ;;  %v680_v27 = vpack.c.bf16 %v348_v20, %v344_v19  ;;  %v343_v28 = vld [vmem:[#allocation6 + $0x240] sm:$0xff]  ;;  %v326_v30 = vld [vmem:[#allocation6 + $0x1b8] sm:$0xff] }
  0x5a   :  { %711 = vmatpush1.bf16.msra.mxu0 %v710_v37  ;;  %v347_v29 = vld [vmem:[#allocation6 + $0x260] sm:$0xff]  ;;  %v352_v31 = vld [vmem:[#allocation6 + $0x288] sm:$0xff]  ;;  %v730_v33 = vpack.c.bf16 %v317_v23, %v313_v22  ;;  %v321_v34 = vld [vmem:[#allocation6 + $0x190] sm:$0xff]  ;;  %v732_v37 = vpack.c.bf16 %v326_v30, %v322_v26 }
  0x5b   :  { %713 = vmatprep.subr.bf16.mxu0 %v712_v41  ;;  %v356_v32 = vld [vmem:[#allocation6 + $0x2a8] sm:$0xff]  ;;  %v325_v35 = vld [vmem:[#allocation6 + $0x1b0] sm:$0xff]  ;;  %v682_v36 = vpack.c.bf16 %v347_v29, %v343_v28  ;;  %v330_v38 = vld [vmem:[#allocation6 + $0x1d8] sm:$0xff] }
  0x5c   :  { %667 = vmatpush1.bf16.msra.mxu1 %v666_v52  ;;  %v684_v39 = vpack.c.bf16 %v356_v32, %v352_v31  ;;  %v351_v40 = vld [vmem:[#allocation6 + $0x280] sm:$0xff]  ;;  %v334_v42 = vld [vmem:[#allocation6 + $0x1f8] sm:$0xff]  ;;  %v360_v43 = vld [vmem:[#allocation6 + $0x2c8] sm:$0xff]  ;;  %v734_v45 = vpack.c.bf16 %v325_v35, %v321_v34 }
  0x5d   :  { %669 = vmatprep.subr.bf16.mxu1 %v668_v55  ;;  %v355_v41 = vld [vmem:[#allocation6 + $0x2a0] sm:$0xff]  ;;  %v364_v44 = vld [vmem:[#allocation6 + $0x2e8] sm:$0xff]  ;;  %v329_v46 = vld [vmem:[#allocation6 + $0x1d0] sm:$0xff] }
  0x5e   :  { %715 = vmatpush1.bf16.msra.mxu0 %v714_v49  ;;  %v333_v47 = vld [vmem:[#allocation6 + $0x1f0] sm:$0xff]  ;;  %v686_v48 = vpack.c.bf16 %v355_v41, %v351_v40  ;;  %v736_v49 = vpack.c.bf16 %v334_v42, %v330_v38  ;;  %v338_v50 = vld [vmem:[#allocation6 + $0x218] sm:$0xff]  ;;  %v688_v51 = vpack.c.bf16 %v364_v44, %v360_v43  ;;  %v359_v52 = vld [vmem:[#allocation6 + $0x2c0] sm:$0xff] }
  0x5f   :  { %717 = vmatprep.subr.bf16.mxu0 %v716_v53  ;;  %v363_v53 = vld [vmem:[#allocation6 + $0x2e0] sm:$0xff]  ;;  %v342_v54 = vld [vmem:[#allocation6 + $0x238] sm:$0xff]  ;;  %v368_v55 = vld [vmem:[#allocation6 + $0x308] sm:$0xff]  ;;  %v738_v57 = vpack.c.bf16 %v333_v47, %v329_v46 }
  0x60   :  { %671 = vmatpush1.bf16.msra.mxu1 %v670_v0  ;;  %v372_v56 = vld [vmem:[#allocation6 + $0x328] sm:$0xff]  ;;  %v337_v58 = vld [vmem:[#allocation6 + $0x210] sm:$0xff]  ;;  %v690_v60 = vpack.c.bf16 %v363_v53, %v359_v52  ;;  %v346_v62 = vld [vmem:[#allocation6 + $0x258] sm:$0xff] }
  0x61   :  { %673 = vmatprep.subr.bf16.mxu1 %v672_v3  ;;  %v341_v59 = vld [vmem:[#allocation6 + $0x230] sm:$0xff]  ;;  %v692_v63 = vpack.c.bf16 %v372_v56, %v368_v55  ;;  %v367_v0 = vld [vmem:[#allocation6 + $0x300] sm:$0xff]  ;;  %v350_v2 = vld [vmem:[#allocation6 + $0x278] sm:$0xff] }
  0x62   :  { %719 = vmatpush1.bf16.msra.mxu0 %v718_v61  ;;  %v740_v61 = vpack.c.bf16 %v342_v54, %v338_v50  ;;  %v376_v3 = vld [vmem:[#allocation6 + $0x348] sm:$0xff]  ;;  %v742_v5 = vpack.c.bf16 %v341_v59, %v337_v58  ;;  %v345_v6 = vld [vmem:[#allocation6 + $0x250] sm:$0xff]  ;;  %v744_v8 = vpack.c.bf16 %v350_v2, %v346_v62  ;;  %v375_v11 = vld [vmem:[#allocation6 + $0x340] sm:$0xff] }
  0x63   :  { %721 = vmatprep.subr.bf16.mxu0 %v720_v1  ;;  %v371_v1 = vld [vmem:[#allocation6 + $0x320] sm:$0xff]  ;;  %v380_v4 = vld [vmem:[#allocation6 + $0x368] sm:$0xff]  ;;  %v358_v14 = vld [vmem:[#allocation6 + $0x2b8] sm:$0xff] }
  0x64   :  { %675 = vmatpush1.bf16.msra.mxu1 %v674_v12  ;;  %v694_v7 = vpack.c.bf16 %v371_v1, %v367_v0  ;;  %v696_v10 = vpack.c.bf16 %v380_v4, %v376_v3  ;;  %v379_v12 = vld [vmem:[#allocation6 + $0x360] sm:$0xff]  ;;  %v353_v18 = vld [vmem:[#allocation6 + $0x290] sm:$0xff]  ;;  %v362_v20 = vld [vmem:[#allocation6 + $0x2d8] sm:$0xff]  ;;  %v257_v1 = vlaneseq }
  0x65   :  { %677 = vmatprep.subr.bf16.mxu1 %v676_v15  ;;  %v698_v16 = vpack.c.bf16 %v379_v12, %v375_v11  ;;  %v357_v19 = vld [vmem:[#allocation6 + $0x2b0] sm:$0xff]  ;;  %v370_v26 = vld [vmem:[#allocation6 + $0x318] sm:$0xff]  ;;  %v388_v40 = vld [vmem:[#allocation6 + $0x3a8] sm:$0xff] }
  0x66   :  { %723 = vmatpush1.bf16.msra.mxu0 %v722_v9  ;;  %v349_v9 = vld [vmem:[#allocation6 + $0x270] sm:$0xff]  ;;  %v750_v22 = vpack.c.bf16 %v357_v19, %v353_v18  ;;  %v378_v32 = vld [vmem:[#allocation6 + $0x358] sm:$0xff]  ;;  %v383_v44 = vld [vmem:[#allocation6 + $0x380] sm:$0xff]  ;;  %v258_v2 = vshrl.u32 %v257_v1, 7  ;;  %v861_v18 = vmov 1966171168  }
  0x67   :  { %725 = vmatprep.subr.bf16.mxu0 %v724_v13  ;;  %v354_v13 = vld [vmem:[#allocation6 + $0x298] sm:$0xff]  ;;  %v746_v15 = vpack.c.bf16 %v349_v9, %v345_v6  ;;  %v369_v30 = vld [vmem:[#allocation6 + $0x310] sm:$0xff]  ;;  %v396_v52 = vld [vmem:[#allocation6 + $0x3e8] sm:$0xff]  ;;  %v570_v19 = vunpack.c.l.s4 %v861_v18  ;;  %vm594_vm1 = vcmp.lt.s32.totalorder %v257_v1, 512 }
  0x68   :  { %679 = vmatpush1.bf16.msra.mxu1 %v678_v24  ;;  %v748_v17 = vpack.c.bf16 %v358_v14, %v354_v13  ;;  %v361_v24 = vld [vmem:[#allocation6 + $0x2d0] sm:$0xff]  ;;  %v386_v41 = vld [vmem:[#allocation6 + $0x398] sm:$0xff]  ;;  %v391_v56 = vld [vmem:[#allocation6 + $0x3c0] sm:$0xff]  ;;  %v259_v3 = vsub.s32 0, %v258_v2 }
  0x69   :  { %681 = vmatprep.subr.bf16.mxu1 %v680_v27  ;;  %v374_v27 = vld [vmem:[#allocation6 + $0x338] sm:$0xff]  ;;  %v373_v31 = vld [vmem:[#allocation6 + $0x330] sm:$0xff]  ;;  %v255_v4 = vld [vmem:[%s964_s4] sm:$0x3] }
  0x6a   :  { %727 = vmatpush1.bf16.msra.mxu0 %v726_v21  ;;  %v366_v21 = vld [vmem:[#allocation6 + $0x2f8] sm:$0xff]  ;;  %v756_v29 = vpack.c.bf16 %v374_v27, %v370_v26  ;;  %v758_v34 = vpack.c.bf16 %v373_v31, %v369_v30  ;;  %v260_v6 = vrot.slane %v255_v4, %v259_v3 }
  0x6b   :  { %729 = vmatprep.subr.bf16.mxu0 %v728_v25  ;;  %v752_v23 = vpack.c.bf16 %v366_v21, %v362_v20  ;;  %v365_v25 = vld [vmem:[#allocation6 + $0x2f0] sm:$0xff]  ;;  %v390_v43 = vld [vmem:[#allocation6 + $0x3b8] sm:$0xff]  ;;  %v415_v20 = vsub.s32 3, %v258_v2 }
  0x6c   :  { %683 = vmatpush1.bf16.msra.mxu1 %v682_v36  ;;  %v754_v28 = vpack.c.bf16 %v365_v25, %v361_v24  ;;  %v377_v36 = vld [vmem:[#allocation6 + $0x350] sm:$0xff]  ;;  %v764_v46 = vpack.c.bf16 %v390_v43, %v386_v41  ;;  %v394_v53 = vld [vmem:[#allocation6 + $0x3d8] sm:$0xff]  ;;  %v571_v24 = vunpack.c.0.s8 %v570_v19 }
  0x6d   :  { %685 = vmatprep.subr.bf16.mxu1 %v684_v39  ;;  %v384_v39 = vld [vmem:[#allocation6 + $0x388] sm:$0xff]  ;;  %v398_v55 = vld [vmem:[#allocation6 + $0x3f8] sm:$0xff] }
  0x6e   :  { %731 = vmatpush1.bf16.msra.mxu0 %v730_v33  ;;  %v382_v33 = vld [vmem:[#allocation6 + $0x378] sm:$0xff]  ;;  %v700_v42 = vpack.c.bf16 %v388_v40, %v384_v39  ;;  %v768_v58 = vpack.c.bf16 %v398_v55, %v394_v53 }
  0x6f   :  { %733 = vmatprep.subr.bf16.mxu0 %v732_v37  ;;  %v760_v35 = vpack.c.bf16 %v382_v33, %v378_v32  ;;  %v381_v37 = vld [vmem:[#allocation6 + $0x370] sm:$0xff]  ;;  %v574_v33 = vsub.s32 %v571_v24, %v258_v2 }
  0x70   :  { %687 = vmatpush1.bf16.msra.mxu1 %v686_v48  ;;  %v762_v38 = vpack.c.bf16 %v381_v37, %v377_v36  ;;  %v385_v48 = vld [vmem:[#allocation6 + $0x390] sm:$0xff] }
  0x71   :  { %689 = vmatprep.subr.bf16.mxu1 %v688_v51  ;;  %v392_v51 = vld [vmem:[#allocation6 + $0x3c8] sm:$0xff] }
  0x72   :  { %735 = vmatpush1.bf16.msra.mxu0 %v734_v45  ;;  %v387_v45 = vld [vmem:[#allocation6 + $0x3a0] sm:$0xff]  ;;  %v704_v54 = vpack.c.bf16 %v396_v52, %v392_v51 }
  0x73   :  { %737 = vmatprep.subr.bf16.mxu0 %v736_v49  ;;  %v702_v47 = vpack.c.bf16 %v387_v45, %v383_v44  ;;  %v389_v49 = vld [vmem:[#allocation6 + $0x3b0] sm:$0xff] }
  0x74   :  { %691 = vmatpush1.bf16.msra.mxu1 %v690_v60  ;;  %v766_v50 = vpack.c.bf16 %v389_v49, %v385_v48  ;;  %v393_v60 = vld [vmem:[#allocation6 + $0x3d0] sm:$0xff] }
  0x75   :  { %693 = vmatprep.subr.bf16.mxu1 %v692_v63 }
  0x76   :  { %739 = vmatpush1.bf16.msra.mxu0 %v738_v57  ;;  %v395_v57 = vld [vmem:[#allocation6 + $0x3e0] sm:$0xff] }
  0x77   :  { %741 = vmatprep.subr.bf16.mxu0 %v740_v61  ;;  %v706_v59 = vpack.c.bf16 %v395_v57, %v391_v56  ;;  %v397_v61 = vld [vmem:[#allocation6 + $0x3f0] sm:$0xff] }
  0x78   :  { %695 = vmatpush1.bf16.msra.mxu1 %v694_v7  ;;  %v770_v62 = vpack.c.bf16 %v397_v61, %v393_v60 }
  0x79   :  { %697 = vmatprep.subr.bf16.mxu1 %v696_v10 }
  0x7a   :  { %743 = vmatpush1.bf16.msra.mxu0 %v742_v5  ;;  %v263_v5 = vsub.s32 1, %v258_v2 }
  0x7b   :  { %745 = vmatprep.subr.bf16.mxu0 %v744_v8 }
  0x7c   :  { %699 = vmatpush1.bf16.msra.mxu1 %v698_v16  ;;  %v264_v8 = vrot.slane %v255_v4, %v263_v5  ;;  %v411_v16 = vsub.s32 2, %v258_v2 }
  0x7d   :  { %701 = vmatprep.subr.bf16.mxu1 %v700_v42 }
  0x7e   :  { %747 = vmatpush1.bf16.msra.mxu0 %v746_v15 }
  0x7f   :  { %749 = vmatprep.subr.bf16.mxu0 %v748_v17  ;;  %v399_v17 = vld [vmem:[%s966_s6] sm:$0xf] }
  0x80   :  { %703 = vmatpush1.bf16.msra.mxu1 %v702_v47  ;;  %v404_v21 = vrot.slane %v399_v17, %v259_v3  ;;  %v416_v25 = vrot.slane %v399_v17, %v415_v20 }
  0x81   :  { %705 = vmatprep.subr.bf16.mxu1 %v704_v54 }
  0x82   :  { %751 = vmatpush1.bf16.msra.mxu0 %v750_v22  ;;  %v412_v22 = vrot.slane %v399_v17, %v411_v16 }
  0x83   :  { %753 = vmatprep.subr.bf16.mxu0 %v752_v23  ;;  %v408_v23 = vrot.slane %v399_v17, %v263_v5 }
  0x84   :  { %707 = vmatpush1.bf16.msra.mxu1 %v706_v59 }
  0x86   :  { %755 = vmatpush1.bf16.msra.mxu0 %v754_v28 }
  0x87   :  { %757 = vmatprep.subr.bf16.mxu0 %v756_v29 }
  0x8a   :  { %759 = vmatpush1.bf16.msra.mxu0 %v758_v34 }
  0x8b   :  { %761 = vmatprep.subr.bf16.mxu0 %v760_v35 }
  0x8e   :  { %763 = vmatpush1.bf16.msra.mxu0 %v762_v38 }
  0x8f   :  { %765 = vmatprep.subr.bf16.mxu0 %v764_v46 }
  0x92   :  { %767 = vmatpush1.bf16.msra.mxu0 %v766_v50 }
  0x93   :  { %769 = vmatprep.subr.bf16.mxu0 %v768_v58 }
  0x96   :  { %771 = vmatpush1.bf16.msra.mxu0 %v770_v62 }
 0x11a   :  { %v179_v63 = vpop.f32.mrb[0].mxu1 }
 0x11b   :  { %v181_v0 = vpop.f32.mrb[1].mxu1 }
 0x12c   :  { %v250_v7 = vpop.f32.mrb[0].mxu0 }
 0x12d   :  { %v251_v9 = vadd.f32 %v250_v7, %v179_v63  ;;  %v252_v10 = vpop.f32.mrb[1].mxu0 }
 0x12e   :  { %v253_v11 = vadd.f32 %v252_v10, %v181_v0 }
 0x12f   :  { %v267_v12 = vadd.f32 %v260_v6, %v251_v9 }
 0x130   :  { %v268_v13 = vadd.f32 %v264_v8, %v253_v11 }
 0x131   :  { %v269_v15 = vmax.f32 %v267_v12, 0.0 }
 0x132   :  { %v270_v14 = vmax.f32 %v268_v13, 0.0 }
 0x134   :  { %485 = vmatprep.mubr.f32.mxu1 %v270_v14  ;;  %556 = vmatprep.mubr.f32.mxu0 %v270_v14 }
 0x135   :  { %486 = vmatmul.mubr.f32.vlgmr.msra.gmra.mrb[2].mxu1 %v269_v15  ;;  %557 = vmatmul.mubr.f32.vlgmr.msra.gmra.mrb[2].mxu0 %v269_v15 }
 0x208   :  { %v487_v26 = vpop.f32.mrb[2].mxu1  ;;  %v558_v27 = vpop.f32.mrb[2].mxu0 }
 0x209   :  { %v488_v28 = vadd.f32 %v487_v26, %v404_v21  ;;  %v559_v29 = vadd.f32 %v558_v27, %v412_v22  ;;  %v489_v30 = vpop.f32.mrb[3].mxu1  ;;  %v560_v31 = vpop.f32.mrb[3].mxu0 }
 0x20a   :  { %v490_v32 = vadd.f32 %v489_v30, %v408_v23  ;;  %v561_v34 = vadd.f32 %v560_v31, %v416_v25 }
 0x20c   :  { %v567_v35 = vcombine.low %v488_v28, %v490_v32  ;;  %v568_v36 = vcombine.low %v559_v29, %v561_v34 }
 0x20e   :  { %v575_v37 = vrot.slane %v567_v35, %v574_v33  ;;  %v582_v38 = vrot.slane %v568_v36, %v574_v33 }
 0x210   :  { %v583_v39 = vcombine.low %v575_v37, %v582_v38 }
 0x212   :  { %v590_v40 = vrot.slane %v583_v39, %v574_v33 }
 0x214   :  { %596 = vst.msk [vmem:[%s967_s7] sm:$0xf] %vm594_vm1, %v590_v40 }
 0x215   :  { %601 = vsyncpa [#allocation3], 1 }
 0x216   :  { %602 = vsyncpa [#allocation5], 1 }

</bundles_post_ra>
